<compile_context>
chip_gen: v5e
topology: v5e:2x2
jax: 0.10.0
libtpu: 0.0.40
codegen_flags: <defaults>
</compile_context>

<pallas_src>
import functools

import jax
import jax.numpy as jnp
from jax.experimental import pallas as pl
from jax.experimental.pallas import tpu as pltpu


# ---------------------------------------------------------------------------
# Kernel
# ---------------------------------------------------------------------------
def _fused_mlp_kernel(*refs, num_layers: int):
    # refs = (x_ref, w0_ref, b0_ref, w1_ref, b1_ref, ..., o_ref)
    x_ref = refs[0]
    o_ref = refs[-1]
    y = x_ref[...]                                    # (tm, D) bf16
    for l in range(num_layers):
        w_ref = refs[1 + 2 * l]                       # (K_l, N_l) bf16
        b_ref = refs[2 + 2 * l]                       # (1,   N_l) fp32
        # bf16 x bf16 MXU matmul with fp32 accumulation.  First iteration the
        # cast is a no-op (x is already bf16); later iterations cast the fp32
        # activation back down for the MXU.
        y = jnp.dot(y.astype(jnp.bfloat16), w_ref[...],
                    preferred_element_type=jnp.float32)
        y = y + b_ref[...]                            # fp32 bias, broadcast rows
        if l < num_layers - 1:                        # no ReLU on final layer
            y = jnp.maximum(y, 0.0)
    o_ref[...] = y.astype(o_ref.dtype)


# ---------------------------------------------------------------------------
# Params
# ---------------------------------------------------------------------------
def init_mlp_readout_params(key, input_dim, output_dim, L=2):
    """Deterministic synthetic params matching MLPReadout.__init__ shapes.

    Layer l (l < L): Linear(input_dim // 2**l -> input_dim // 2**(l+1))
    Layer L:         Linear(input_dim // 2**L -> output_dim)
    Weights are returned transposed to (in, out), fp32.
    """
    dims = [input_dim // (2 ** l) for l in range(L + 1)] + [output_dim]
    params = []
    for l in range(L + 1):
        d_in, d_out = dims[l], dims[l + 1]
        key, kw, kb = jax.random.split(key, 3)
        bound = 1.0 / jnp.sqrt(jnp.float32(d_in))
        w_t = jax.random.uniform(kw, (d_in, d_out), jnp.float32, -bound, bound)
        b = jax.random.uniform(kb, (d_out,), jnp.float32, -bound, bound)
        params.append((w_t, b))
    return params


def _round_up(x, m):
    return ((x + m - 1) // m) * m


def _cdiv(a, b):
    return (a + b - 1) // b


def prepare_packed_params(params):
    """One-time prep: weights -> bf16 (in, out); biases -> fp32 (1, N).

    No lane padding: the output block's last dim equals the full array
    extent, so a narrow readout (e.g. 8 cols) is written directly.
    Returns (packed_params, output_dim).
    """
    packed = []
    output_dim = params[-1][0].shape[1]
    for w_t, b in params:
        packed.append((w_t.astype(jnp.bfloat16),
                       b.astype(jnp.float32).reshape(1, -1)))
    return packed, output_dim


def _estimate_vmem_bytes(tm, k_in, packed_params, output_dim):
    """Rough per-step VMEM footprint (double-buffered in/out + weights)."""
    x_tile = tm * k_in * 2 * 2                      # bf16 in, 2 buffers
    out_tile = tm * output_dim * 4 * 2              # fp32 out, 2 buffers
    w_bytes = 0
    for w_t, b2d in packed_params:
        w_bytes += w_t.size * 2 + b2d.size * 4
    w_bytes *= 2                                     # default 2 pipeline bufs
    widest = max([k_in] + [w_t.shape[1] for w_t, _ in packed_params])
    inter = tm * widest * 4 * 2                      # fp32 intermediates
    return x_tile + out_tile + w_bytes + inter


# ---------------------------------------------------------------------------
# Forward
# ---------------------------------------------------------------------------
def mlp_readout_forward(packed_params, output_dim, x, *, block_m=1024):
    """Fused MLPReadout forward. x: (M, input_dim) -> (M, output_dim) fp32.

    x is cast to bf16 at the call boundary (in a real model the upstream
    readout would already produce bf16, making the x read half-width).
    """
    M, K = x.shape
    num_layers = len(packed_params)

    # bf16 input (halves the dominant HBM read).
    if x.dtype != jnp.bfloat16:
        x = x.astype(jnp.bfloat16)

    # --- Batch tile -------------------------------------------------------
    # Big tiles amortize the ~0.35 us per-grid-step overhead, but keep the
    # grid at >= 2 steps when M allows so both TensorCores on v7x get work.
    tm = _round_up(max(8, block_m), 8)
    cap_for_two_steps = _round_up(max(8, _cdiv(M, 2)), 8)
    tm = min(tm, cap_for_two_steps)
    m_pad = _round_up(M, tm)
    if m_pad != M:
        x = jnp.pad(x, ((0, m_pad - M), (0, 0)))
    grid = (m_pad // tm,)

    # --- Specs --------------------------------------------------------------
    in_specs = [pl.BlockSpec((tm, K), lambda i: (i, 0))]
    flat_inputs = [x]
    for w_t, b2d in packed_params:
        k_in, n_out = w_t.shape
        # Weights / biases: full-array blocks, same block every grid step
        # -> VMEM-resident, DMA'd once.
        in_specs.append(pl.BlockSpec((k_in, n_out), lambda i: (0, 0)))
        in_specs.append(pl.BlockSpec((1, n_out), lambda i: (0, 0)))
        flat_inputs.append(w_t)
        flat_inputs.append(b2d)

    # Explicit VMEM budget: lift v5e's 16 MiB default, stay <= 48 MiB so big
    # tiles remain safe on v7x's 64 MiB (32 MiB default-scoped) VMEM.
    est = _estimate_vmem_bytes(tm, K, packed_params, output_dim)
    vmem_limit = int(min(48 * 2**20, max(32 * 2**20, 4 * est)))

    out = pl.pallas_call(
        functools.partial(_fused_mlp_kernel, num_layers=num_layers),
        out_shape=jax.ShapeDtypeStruct((m_pad, output_dim), jnp.float32),
        grid=grid,
        in_specs=in_specs,
        # Output block last dim equals the full array extent (legal), so the
        # narrow readout is written directly: no 128-lane padding, no
        # full-width slice re-read afterwards.
        out_specs=pl.BlockSpec((tm, output_dim), lambda i: (i, 0)),
        compiler_params=pltpu.CompilerParams(
            dimension_semantics=("parallel",),
            vmem_limit_bytes=vmem_limit,
        ),
    )(*flat_inputs)

    # Strip batch padding only when it was added (output_dim is tiny, so this
    # touches very little HBM; it is a no-op when tm divides M).
    if m_pad != M:
        out = out[:M]
    return out


# ---------------------------------------------------------------------------
# References
# ---------------------------------------------------------------------------
def mlp_readout_reference_bf16(params, x, L=2):
    """Same math as the kernel: bf16 matmul inputs, fp32 accum/bias/ReLU."""
    y = x
    for l in range(L + 1):
        w_t, b = params[l]
        y = jnp.dot(y.astype(jnp.bfloat16), w_t.astype(jnp.bfloat16),
                    preferred_element_type=jnp.float32) + b
        if l < L:
            y = jnp.maximum(y, 0.0)
    return y


def mlp_readout_reference_f32(params, x, L=2):
    y = x
    for l in range(L):
        w_t, b = params[l]
        y = jnp.maximum(y @ w_t + b, 0.0)
    w_t, b = params[L]
    return y @ w_t + b


# ---------------------------------------------------------------------------
# Main
# ---------------------------------------------------------------------------
if __name__ == "__main__":
    key = jax.random.PRNGKey(0)
    key, kx, kp = jax.random.split(key, 3)

    batch = 256          # with the 2-step cap -> tm=128, grid=(2,)
    input_dim = 128      # -> 64 -> 32 -> output_dim
    output_dim = 8
    L = 2

    x = jax.random.normal(kx, (batch, input_dim), jnp.float32)
    params = init_mlp_readout_params(kp, input_dim, output_dim, L=L)
    packed_params, out_dim = prepare_packed_params(params)

    out = mlp_readout_forward(packed_params, out_dim, x, block_m=1024)
    out = jax.block_until_ready(out)

    assert out.shape == (batch, output_dim), out.shape
    assert out.dtype == jnp.float32, out.dtype

    # Exact-math check vs. a bf16-input / fp32-accum reference (same recipe
    # as the kernel), plus a loose sanity check vs. the pure-fp32 reference.
    ref_bf16 = mlp_readout_reference_bf16(params, x, L=L)
    ref_f32 = mlp_readout_reference_f32(params, x, L=L)
    assert jnp.allclose(out, ref_bf16, atol=1e-3, rtol=1e-3), \
        "mismatch vs bf16-accum reference"
    assert jnp.allclose(out, ref_f32, atol=5e-2, rtol=5e-2), \
        "mismatch vs fp32 reference"

    print("KERNEL_OK")
</pallas_src>

<mosaic_0001>
module attributes {stable_mosaic.version = 11 : i64} {
  func.func @_fused_mlp_kernel(%arg0: i32, %arg1: memref<128x128xbf16, #tpu.memory_space<vmem>>, %arg2: memref<128x64xbf16, #tpu.memory_space<vmem>>, %arg3: memref<1x64xf32, #tpu.memory_space<vmem>>, %arg4: memref<64x32xbf16, #tpu.memory_space<vmem>>, %arg5: memref<1x32xf32, #tpu.memory_space<vmem>>, %arg6: memref<32x8xbf16, #tpu.memory_space<vmem>>, %arg7: memref<1x8xf32, #tpu.memory_space<vmem>>, %arg8: memref<128x8xf32, #tpu.memory_space<vmem>>) attributes {dimension_semantics = [#tpu.dimension_semantics<parallel>], iteration_bounds = array<i64: 2>, scalar_prefetch = 0 : i64, scratch_operands = 0 : i64, tpu.core_type = #tpu.core_type<tc>, window_params = [{transform_indices = @transform_0, window_bounds = array<i64: 128, 128>}, {pipeline_mode = #tpu.pipeline_mode<synchronous>, transform_indices = @transform_1, window_bounds = array<i64: 128, 64>}, {pipeline_mode = #tpu.pipeline_mode<synchronous>, transform_indices = @transform_2, window_bounds = array<i64: 1, 64>}, {pipeline_mode = #tpu.pipeline_mode<synchronous>, transform_indices = @transform_3, window_bounds = array<i64: 64, 32>}, {pipeline_mode = #tpu.pipeline_mode<synchronous>, transform_indices = @transform_4, window_bounds = array<i64: 1, 32>}, {pipeline_mode = #tpu.pipeline_mode<synchronous>, transform_indices = @transform_5, window_bounds = array<i64: 32, 8>}, {pipeline_mode = #tpu.pipeline_mode<synchronous>, transform_indices = @transform_6, window_bounds = array<i64: 1, 8>}, {transform_indices = @transform_7, window_bounds = array<i64: 128, 8>}]} {
    %c0 = arith.constant 0 : index
    %c0_0 = arith.constant 0 : index
    %0 = vector.load %arg1[%c0, %c0_0] : memref<128x128xbf16, #tpu.memory_space<vmem>>, vector<128x128xbf16>
    %c0_1 = arith.constant 0 : index
    %c0_2 = arith.constant 0 : index
    %1 = vector.load %arg2[%c0_1, %c0_2] : memref<128x64xbf16, #tpu.memory_space<vmem>>, vector<128x64xbf16>
    %cst = arith.constant dense<0.000000e+00> : vector<128x64xf32>
    %2 = tpu.matmul %0, %1, %cst {dimension_numbers = #tpu.dot_dimension_numbers<[1], [0], [0], [1], [0, 0, 1, 1], [], []>} : vector<128x128xbf16>, vector<128x64xbf16>, vector<128x64xf32> -> vector<128x64xf32>
    %c0_3 = arith.constant 0 : index
    %c0_4 = arith.constant 0 : index
    %3 = vector.load %arg3[%c0_3, %c0_4] : memref<1x64xf32, #tpu.memory_space<vmem>>, vector<1x64xf32>
    %4 = vector.broadcast %3 : vector<1x64xf32> to vector<128x64xf32>
    %5 = arith.addf %2, %4 : vector<128x64xf32>
    %cst_5 = arith.constant 0.000000e+00 : f32
    %6 = vector.broadcast %cst_5 : f32 to vector<128x64xf32>
    %7 = arith.maximumf %5, %6 : vector<128x64xf32>
    %8 = arith.truncf %7 : vector<128x64xf32> to vector<128x64xbf16>
    %c0_6 = arith.constant 0 : index
    %c0_7 = arith.constant 0 : index
    %9 = vector.load %arg4[%c0_6, %c0_7] : memref<64x32xbf16, #tpu.memory_space<vmem>>, vector<64x32xbf16>
    %cst_8 = arith.constant dense<0.000000e+00> : vector<128x32xf32>
    %10 = tpu.matmul %8, %9, %cst_8 {dimension_numbers = #tpu.dot_dimension_numbers<[1], [0], [0], [1], [0, 0, 1, 1], [], []>} : vector<128x64xbf16>, vector<64x32xbf16>, vector<128x32xf32> -> vector<128x32xf32>
    %c0_9 = arith.constant 0 : index
    %c0_10 = arith.constant 0 : index
    %11 = vector.load %arg5[%c0_9, %c0_10] : memref<1x32xf32, #tpu.memory_space<vmem>>, vector<1x32xf32>
    %12 = vector.broadcast %11 : vector<1x32xf32> to vector<128x32xf32>
    %13 = arith.addf %10, %12 : vector<128x32xf32>
    %cst_11 = arith.constant 0.000000e+00 : f32
    %14 = vector.broadcast %cst_11 : f32 to vector<128x32xf32>
    %15 = arith.maximumf %13, %14 : vector<128x32xf32>
    %16 = arith.truncf %15 : vector<128x32xf32> to vector<128x32xbf16>
    %c0_12 = arith.constant 0 : index
    %c0_13 = arith.constant 0 : index
    %17 = vector.load %arg6[%c0_12, %c0_13] : memref<32x8xbf16, #tpu.memory_space<vmem>>, vector<32x8xbf16>
    %cst_14 = arith.constant dense<0.000000e+00> : vector<128x8xf32>
    %18 = tpu.matmul %16, %17, %cst_14 {dimension_numbers = #tpu.dot_dimension_numbers<[1], [0], [0], [1], [0, 0, 1, 1], [], []>} : vector<128x32xbf16>, vector<32x8xbf16>, vector<128x8xf32> -> vector<128x8xf32>
    %c0_15 = arith.constant 0 : index
    %c0_16 = arith.constant 0 : index
    %19 = vector.load %arg7[%c0_15, %c0_16] : memref<1x8xf32, #tpu.memory_space<vmem>>, vector<1x8xf32>
    %20 = vector.broadcast %19 : vector<1x8xf32> to vector<128x8xf32>
    %21 = arith.addf %18, %20 : vector<128x8xf32>
    %c0_17 = arith.constant 0 : index
    %c0_18 = arith.constant 0 : index
    %22 = vector.load %arg8[%c0_17, %c0_18] : memref<128x8xf32, #tpu.memory_space<vmem>>, vector<128x8xf32>
    tpu.vector_store %arg8[%c0_17, %c0_18], %21 {strides = array<i32>} : memref<128x8xf32, #tpu.memory_space<vmem>>, vector<128x8xf32>,
    return
  }
  func.func @transform_0(%arg0: i32) -> (i32, i32) {
    %c0_i32 = arith.constant 0 : i32
    %c0_i32_0 = arith.constant 0 : i32
    return %arg0, %c0_i32 : i32, i32
  }
  func.func @transform_1(%arg0: i32) -> (i32, i32) {
    %c0_i32 = arith.constant 0 : i32
    %c0_i32_0 = arith.constant 0 : i32
    %c0_i32_1 = arith.constant 0 : i32
    return %c0_i32, %c0_i32_0 : i32, i32
  }
  func.func @transform_2(%arg0: i32) -> (i32, i32) {
    %c0_i32 = arith.constant 0 : i32
    %c0_i32_0 = arith.constant 0 : i32
    %c0_i32_1 = arith.constant 0 : i32
    return %c0_i32, %c0_i32_0 : i32, i32
  }
  func.func @transform_3(%arg0: i32) -> (i32, i32) {
    %c0_i32 = arith.constant 0 : i32
    %c0_i32_0 = arith.constant 0 : i32
    %c0_i32_1 = arith.constant 0 : i32
    return %c0_i32, %c0_i32_0 : i32, i32
  }
  func.func @transform_4(%arg0: i32) -> (i32, i32) {
    %c0_i32 = arith.constant 0 : i32
    %c0_i32_0 = arith.constant 0 : i32
    %c0_i32_1 = arith.constant 0 : i32
    return %c0_i32, %c0_i32_0 : i32, i32
  }
  func.func @transform_5(%arg0: i32) -> (i32, i32) {
    %c0_i32 = arith.constant 0 : i32
    %c0_i32_0 = arith.constant 0 : i32
    %c0_i32_1 = arith.constant 0 : i32
    return %c0_i32, %c0_i32_0 : i32, i32
  }
  func.func @transform_6(%arg0: i32) -> (i32, i32) {
    %c0_i32 = arith.constant 0 : i32
    %c0_i32_0 = arith.constant 0 : i32
    %c0_i32_1 = arith.constant 0 : i32
    return %c0_i32, %c0_i32_0 : i32, i32
  }
  func.func @transform_7(%arg0: i32) -> (i32, i32) {
    %c0_i32 = arith.constant 0 : i32
    %c0_i32_0 = arith.constant 0 : i32
    return %arg0, %c0_i32 : i32, i32
  }
}

</mosaic_0001>

<bundles_post_ra>
// kernel: tpu_custom_call.1
= control target key start
LH: loop header
LB: loop body
LE: loop exit
PB: predicated region body
PF: predicated region fallthrough
CT: control target
= control target key end

     0   :  { %12 = vsyncpa [#allocation3], 0  ;;  %s1329_s0 = inlined_call_operand.hbm [shape: bf16[256,128], index: 0, kind: input, shape index: {}]   ;;  %s1330_s1 = inlined_call_operand.vmem [shape: bf16[128,64], index: 1, kind: input, shape index: {}]   ;;  %s1331_s2 = inlined_call_operand.vmem [shape: f32[1,64], index: 2, kind: input, shape index: {}]   ;;  %s1332_s3 = inlined_call_operand.vmem [shape: bf16[64,32], index: 3, kind: input, shape index: {}]   ;;  %s1333_s4 = inlined_call_operand.vmem [shape: f32[1,32], index: 4, kind: input, shape index: {}]   ;;  %s1334_s5 = inlined_call_operand.vmem [shape: bf16[32,8], index: 5, kind: input, shape index: {}]   ;;  %s1335_s6 = inlined_call_operand.vmem [shape: f32[1,8], index: 6, kind: input, shape index: {}]   ;;  %s1336_s7 = inlined_call_operand.vmem [shape: f32[256,8], index: 7, kind: output, shape index: {}]  }
   0x1   :  { %14 = vsyncpa [#allocation3 + $0x1], 0  ;;  %s1127_s24 = smov 0   ;;  %s1129_s25 = smov 0  }
   0x2   :  { %s1131_s26 = smov 0   ;;  %s1133_s27 = smov 0  }
   0x3 LB: > { %s821_s28 = sadd.s32 4294967295, %s1083_s27   ;;  %s1147_s29 = sadd.s32 1, %s1083_s27   ;;  %s1083_s27 = sphi %s1133_s27, %s1343_s27   ;;  %s1079_s26 = sphi %s1131_s26, %s1342_s26   ;;  %s1075_s25 = sphi %s1129_s25, %s1341_s25   ;;  %s1071_s24 = sphi %s1127_s24, %s1340_s24  }
   0x4   : > { %s24_s30 = ssub.s32 %s1083_s27, %s1147_s29  ;;  %s27_s8 = sadd.s32 1, %s1079_s26 }
   0x5   : > { %p25_p0 = scmp.eq.s32.totalorder %s24_s30, 0  ;;  %p34_p1 = scmp.ne.s32.totalorder %s1079_s26, %s1075_s25 }
   0x6   : > { %p35_p2 = scmp.eq.s32.totalorder %s1083_s27, 0  ;;  %p40_p3 = scmp.ne.s32.totalorder %s1075_s25, %s1071_s24 }
   0x7   : > { %s1157_s9 = scalar_select %p25_p0, %s1079_s26, %s27_s8  }
   0x8   : > { %p1159_p4 = por %p35_p2, %p34_p1  ;;  %p41_p5 = scmp.eq.s32.totalorder %s821_s28, 0 }
   0x9   : > { %p981_p6 = scmp.lt.s32.totalorder %s1083_s27, 2  ;;  %s234_s12 = sand.u32 1, %s1079_s26  }
   0xa   : > { %p1166_p7 = por %p41_p5, %p40_p3  ;;  %s825_s13 = sshll.u32 %s234_s12, 6 }
   0xb   : > { %s938_s14 = sshll.u32 %s1083_s27, 6  ;;  %s238_s18 = scalar_lea.vmem [#allocation2], %s825_s13 }
   0xc   : > { %s243_s17 = scalar_lea.hbm %s1329_s0, %s938_s14  ;;  %s246_s19 = sshll.u32 %s238_s18, 4  ;;  %s247_s19 = int_to_ptr.vmem [resolvable:$true] %s246_s19 }
   0xd   : > { %s244_s20 = sshll.u32 %s243_s17, 4  ;;  %p1177_p8 = pnand %p981_p6, %p1159_p4  ;;  %s245_s20 = int_to_ptr.hbm [resolvable:$true] %s244_s20 }
   0xe   : > { %p828_p9 = scmp.ge.s32.totalorder %s1083_s27, 1  ;;  %s235_s22 = scalar_lea.sflag [#allocation3], %s234_s12 }
   0xf   : > { %s1019_s23 = sshra.s32 %s245_s20, 4  ;;  %p1023_p11 = pneg %p1177_p8  ;;  %s1020_s23 = int_to_ptr.hbm [resolvable:$true] %s1019_s23 }
  0x10   : > { %s1021_s24 = scalar_lea.hbm %s1020_s23, 64  ;;  %s1026_s13 = scalar_lea.hbm %s1329_s0, 128 }
  0x11   : > { %p1022_p10 = scmp.ne.s32.totalorder %s1020_s23, %s1021_s24  ;;  %p1027_p0 = scmp.lt.s32.totalorder %s1020_s23, %s1329_s0 }
  0x12   : > { %p1028_p1 = scmp.lt.s32.totalorder %s1026_s13, %s1021_s24 }
  0x13   : > { %p1024_p12 = pnand %p1023_p11, %p1022_p10 }
  0x14   : > { %p1029_p2 = por %p1028_p1, %p1027_p0 }
  0x15   : > { %p1025_p13 = pneg %p1024_p12 }
  0x17   : > { %p1030_p3 = pnand %p1029_p2, %p1025_p13 }
  0x19   : > { %1033 = shalt.err (!%p1030_p3)
}
  0x1a   : > { %s1085_s12 = smov 64   ;;  %s1086_s15 = smov 4  }
  0x1b   : > { %980 = dma.hbm_to_vmem [thread:$0]  (!%p1177_p8), %s245_s20, 1024, %s247_s19, %s235_s22, %s1085_s12, %s1085_s12, %s1086_s15  }
  0x1c   : > { %p254_p4 = scmp.lt.s32.totalorder %s1083_s27, 3 }
  0x1e   : > { %p255_p5 = pnand %p828_p9, %p254_p4 }
  0x1f   : > { %s260_s16 = sand.u32 (!%p255_p5), 1, %s1075_s25  }
  0x20   : > { %258 = sbr.rel (%p255_p5) target bundleno = 589 (0x24d), region = 48  ;;  %s829_s17 = sshll.u32 (!%p255_p5), %s260_s16, 6 }
  0x21   : > { %s261_s18 = scalar_lea.sflag (!%p255_p5), [#allocation3], %s260_s16  ;;  %s1196_s23 = scalar_lea.vmem (!%p255_p5), [#allocation2], %s829_s17 }
  0x25   : > { %1066 = dma.done.wait (%p1166_p7), %s261_s18, 1024  }
  0x26   : > { %1068 = vsyncadd (%p1166_p7), %s261_s18, 4294966272  ;;  %v954_v0 = vld [vmem:[%s1330_s1 + $0x38] sm:$0xff]  ;;  %v953_v1 = vld [vmem:[%s1330_s1 + $0x30] sm:$0xff]  ;;  %vm545_vm0 = vcmask 523264   ;;  %vm663_vm1 = vcmask 261120   ;;  %s830_s18 = sshll.u32 %s821_s28, 4 }
  0x27   : > { %436 = vmatpush.bf16.msra.mxu0 %v954_v0  ;;  %961 = vmatpush.bf16.msra.mxu3 %v954_v0  ;;  %v952_v2 = vld [vmem:[%s1330_s1 + $0x28] sm:$0xff]  ;;  %v951_v3 = vld [vmem:[%s1330_s1 + $0x20] sm:$0xff]  ;;  %v950_v4 = vld [vmem:[%s1330_s1 + $0x18] sm:$0xff]  ;;  %p298_p6 = scmp.lt.s32.totalorder %s830_s18, 31  ;;  %vm737_vm2 = vcmask 64512  }
  0x28   : > { %v949_v5 = vld [vmem:[%s1330_s1 + $0x10] sm:$0xff]  ;;  %v948_v6 = vld [vmem:[%s1330_s1 + $0x8] sm:$0xff]  ;;  %v947_v7 = vld [vmem:[%s1330_s1] sm:$0xff] }
  0x29   : > { %v939_v8 = vld [vmem:[%s1196_s23] sm:$0xff]  ;;  %v945_v9 = vld [vmem:[%s1196_s23 + $0x30] sm:$0xff]  ;;  %v940_v10 = vld [vmem:[%s1196_s23 + $0x8] sm:$0xff]  ;;  %s1345_s18 = smov (!%p298_p6, %s830_s18), 31 }
  0x2a   : > { %v946_v11 = vld [vmem:[%s1196_s23 + $0x38] sm:$0xff]  ;;  %v941_v12 = vld [vmem:[%s1196_s23 + $0x10] sm:$0xff]  ;;  %v943_v14 = vld [vmem:[%s1196_s23 + $0x20] sm:$0xff]  ;;  %s831_s24 = sshll.u32 %s1345_s18, 3 }
  0x2b   : > { %437 = vmatpush.bf16.msra.mxu0 %v953_v1  ;;  %962 = vmatpush.bf16.msra.mxu3 %v953_v1  ;;  %v942_v13 = vld [vmem:[%s1196_s23 + $0x18] sm:$0xff]  ;;  %v944_v15 = vld [vmem:[%s1196_s23 + $0x28] sm:$0xff]  ;;  %v957_v17 = vld [vmem:[%s1332_s3 + $0x10] sm:$0xff]  ;;  %s1282_s22 = scalar_lea.vmem %s1336_s7, %s831_s24 }
  0x2c   : > { %v958_v16 = vld [vmem:[%s1332_s3 + $0x18] sm:$0xff]  ;;  %v956_v18 = vld [vmem:[%s1332_s3 + $0x8] sm:$0xff]  ;;  %v955_v19 = vld [vmem:[%s1332_s3] sm:$0xff] }
  0x2d   : > { %574 = vmatpush.bf16.msra.mxu1 %v958_v16  ;;  %v1016_v21 = vld [vmem:[%s1331_s2] ss:$0 sm:$0xff] }
  0x2f   : > { %438 = vmatpush.bf16.msra.mxu0 %v952_v2  ;;  %963 = vmatpush.bf16.msra.mxu3 %v952_v2 }
  0x31   : > { %575 = vmatpush.bf16.msra.mxu1 %v957_v17 }
  0x33   : > { %439 = vmatpush.bf16.msra.mxu0 %v951_v3  ;;  %964 = vmatpush.bf16.msra.mxu3 %v951_v3 }
  0x35   : > { %576 = vmatpush.bf16.msra.mxu1 %v956_v18 }
  0x37   : > { %440 = vmatpush.bf16.msra.mxu0 %v950_v4  ;;  %965 = vmatpush.bf16.msra.mxu3 %v950_v4 }
  0x39   : > { %577 = vmatpush.bf16.msra.mxu1 %v955_v19 }
  0x3b   : > { %441 = vmatpush.bf16.msra.mxu0 %v949_v5  ;;  %966 = vmatpush.bf16.msra.mxu3 %v949_v5 }
  0x3f   : > { %442 = vmatpush.bf16.msra.mxu0 %v948_v6  ;;  %967 = vmatpush.bf16.msra.mxu3 %v948_v6 }
  0x43   : > { %443 = vmatpush.bf16.msra.mxu0 %v947_v7  ;;  %968 = vmatpush.bf16.msra.mxu3 %v947_v7 }
  0x46   : > { %444 = vmatmul.bf16.vlgmr.msra.gmra.mxu0 %v939_v8  ;;  %474 = vmatmul.bf16.vlgmr.msra.gmra.mxu3 %v945_v9 }
  0x47   : > { %969 = vmatpush.bf16.msrb.mxu3 %v958_v16  ;;  %v1017_v16 = vld [vmem:[%s1333_s4] ss:$0 sm:$0xff] }
  0x4b   : > { %970 = vmatpush.bf16.msrb.mxu3 %v957_v17 }
  0x4f   : > { %971 = vmatpush.bf16.msrb.mxu3 %v956_v18 }
  0x53   : > { %972 = vmatpush.bf16.msrb.mxu3 %v955_v19 }
  0x56   : > { %449 = vmatmul.bf16.gmra.mxu0 %v940_v10  ;;  %479 = vmatmul.bf16.gmra.mxu3 %v946_v11 }
  0x66   : > { %454 = vmatmul.bf16.gmra.mxu0 %v941_v12 }
  0x76   : > { %459 = vmatmul.bf16.gmra.mxu0 %v942_v13  ;;  %v960_v13 = vld [vmem:[%s1334_s5 + $0x8] sm:$0xff] }
  0x77   : > { %694 = vmatpush.bf16.msra.mxu2 %v960_v13  ;;  %973 = vmatpush.bf16.msra.mxu3 %v960_v13 }
  0x86   : > { %464 = vmatmul.bf16.gmra.mxu0 %v943_v14  ;;  %v959_v14 = vld [vmem:[%s1334_s5] sm:$0xff] }
  0x87   : > { %695 = vmatpush.bf16.msra.mxu2 %v959_v14  ;;  %974 = vmatpush.bf16.msra.mxu3 %v959_v14 }
  0x96   : > { %469 = vmatmul.bf16.gmra.mxu0 %v944_v15 }
  0xc3   : > { %v445_v20 = vpop.f32.mrf.mxu0 }
  0xc4   : > { %v446_v22 = vadd.f32 %v1016_v21, %v445_v20 }
  0xc6   : > { %v485_v25 = vmax.f32 %v446_v22, 0.0 }
  0xc9   : > { %v475_v29 = vpop.f32.mrf.mxu3 }
  0xca   : > { %v476_v33 = vadd.f32 %v1016_v21, %v475_v29 }
  0xcb   : > { %v447_v23 = vpop.f32.mrf.mxu0 }
  0xcc   : > { %v448_v24 = vadd.f32 %v1016_v21, %v447_v23  ;;  %v497_v38 = vmax.f32 %v476_v33, 0.0 }
  0xce   : > { %v486_v26 = vmax.f32 %v448_v24, 0.0 }
  0xd0   : > { %v501_v27 = vpack.c.bf16 %v486_v26, %v485_v25 }
  0xd1   : > { %v477_v34 = vpop.f32.mrf.mxu3 }
  0xd2   : > { %912 = vmatmul.msk.bf16.vlgmr.msra.gmra.mxu1 %vm545_vm0, %v501_v27  ;;  %v478_v39 = vadd.f32 %v1016_v21, %v477_v34 }
  0xd3   : > { %v450_v28 = vpop.f32.mrf.mxu0 }
  0xd4   : > { %v451_v30 = vadd.f32 %v1016_v21, %v450_v28  ;;  %v498_v40 = vmax.f32 %v478_v39, 0.0 }
  0xd6   : > { %v487_v35 = vmax.f32 %v451_v30, 0.0  ;;  %v507_v42 = vpack.c.bf16 %v498_v40, %v497_v38 }
  0xd9   : > { %v480_v43 = vpop.f32.mrf.mxu3 }
  0xda   : > { %v481_v45 = vadd.f32 %v1016_v21, %v480_v43 }
  0xdb   : > { %v452_v31 = vpop.f32.mrf.mxu0 }
  0xdc   : > { %v453_v32 = vadd.f32 %v1016_v21, %v452_v31  ;;  %v499_v51 = vmax.f32 %v481_v45, 0.0 }
  0xde   : > { %v488_v36 = vmax.f32 %v453_v32, 0.0 }
  0xe0   : > { %v502_v37 = vpack.c.bf16 %v488_v36, %v487_v35 }
  0xe1   : > { %v482_v48 = vpop.f32.mrf.mxu3 }
  0xe2   : > { %913 = vmatmul.msk.bf16.gmra.mxu1 %vm545_vm0, %v502_v37  ;;  %v483_v52 = vadd.f32 %v1016_v21, %v482_v48 }
  0xe3   : > { %v455_v41 = vpop.f32.mrf.mxu0 }
  0xe4   : > { %v456_v44 = vadd.f32 %v1016_v21, %v455_v41  ;;  %v500_v54 = vmax.f32 %v483_v52, 0.0 }
  0xe6   : > { %v489_v49 = vmax.f32 %v456_v44, 0.0  ;;  %v508_v55 = vpack.c.bf16 %v500_v54, %v499_v51 }
  0xe8   : > { %919 = vmatmul.msk.bf16.vlgmr.msrb.gmra.mxu3 %vm545_vm0, %v508_v55 }
  0xeb   : > { %v457_v46 = vpop.f32.mrf.mxu0 }
  0xec   : > { %v458_v47 = vadd.f32 %v1016_v21, %v457_v46 }
  0xee   : > { %v490_v50 = vmax.f32 %v458_v47, 0.0 }
  0xf0   : > { %v503_v53 = vpack.c.bf16 %v490_v50, %v489_v49 }
  0xf2   : > { %914 = vmatmul.msk.bf16.gmra.mxu1 %vm545_vm0, %v503_v53 }
  0xf3   : > { %v460_v56 = vpop.f32.mrf.mxu0 }
  0xf4   : > { %v461_v57 = vadd.f32 %v1016_v21, %v460_v56 }
  0xf6   : > { %v491_v60 = vmax.f32 %v461_v57, 0.0 }
  0xfb   : > { %v462_v58 = vpop.f32.mrf.mxu0 }
  0xfc   : > { %v463_v59 = vadd.f32 %v1016_v21, %v462_v58 }
  0xfe   : > { %v492_v61 = vmax.f32 %v463_v59, 0.0 }
 0x100   : > { %v504_v62 = vpack.c.bf16 %v492_v61, %v491_v60 }
 0x102   : > { %915 = vmatmul.msk.bf16.gmra.mxu1 %vm545_vm0, %v504_v62 }
 0x103   : > { %v465_v63 = vpop.f32.mrf.mxu0 }
 0x104   : > { %v466_v0 = vadd.f32 %v1016_v21, %v465_v63 }
 0x106   : > { %v493_v3 = vmax.f32 %v466_v0, 0.0 }
 0x10b   : > { %v467_v1 = vpop.f32.mrf.mxu0 }
 0x10c   : > { %v468_v2 = vadd.f32 %v1016_v21, %v467_v1 }
 0x10e   : > { %v494_v4 = vmax.f32 %v468_v2, 0.0 }
 0x110   : > { %v505_v5 = vpack.c.bf16 %v494_v4, %v493_v3 }
 0x112   : > { %916 = vmatmul.msk.bf16.gmra.mxu1 %vm545_vm0, %v505_v5 }
 0x113   : > { %v470_v6 = vpop.f32.mrf.mxu0 }
 0x114   : > { %v471_v7 = vadd.f32 %v1016_v21, %v470_v6 }
 0x116   : > { %v495_v10 = vmax.f32 %v471_v7, 0.0 }
 0x11b   : > { %v472_v8 = vpop.f32.mrf.mxu0 }
 0x11c   : > { %v473_v9 = vadd.f32 %v1016_v21, %v472_v8  ;;  %v1018_v8 = vld [vmem:[%s1335_s6] ss:$0 sm:$0xff] }
 0x11e   : > { %v496_v11 = vmax.f32 %v473_v9, 0.0 }
 0x120   : > { %v506_v12 = vpack.c.bf16 %v496_v11, %v495_v10 }
 0x122   : > { %917 = vmatmul.msk.bf16.gmra.mxu1 %vm545_vm0, %v506_v12 }
 0x132   : > { %918 = vmatmul.msk.bf16.gmra.mxu1 %vm545_vm0, %v507_v42 }
 0x14f   : > { %v579_v15 = vpop.f32.mrf.mxu1 }
 0x150   : > { %v580_v17 = vadd.f32 %v1017_v16, %v579_v15 }
 0x152   : > { %v619_v20 = vmax.f32 %v580_v17, 0.0 }
 0x157   : > { %v581_v18 = vpop.f32.mrf.mxu1 }
 0x158   : > { %v582_v19 = vadd.f32 %v1017_v16, %v581_v18 }
 0x15a   : > { %v620_v21 = vmax.f32 %v582_v19, 0.0 }
 0x15c   : > { %v635_v22 = vpack.c.bf16 %v620_v21, %v619_v20 }
 0x15e   : > { %928 = vmatmul.msk.bf16.vlgmr.msra.gmra.mxu2 %vm663_vm1, %v635_v22 }
 0x15f   : > { %v584_v23 = vpop.f32.mrf.mxu1 }
 0x160   : > { %v585_v24 = vadd.f32 %v1017_v16, %v584_v23 }
 0x162   : > { %v621_v27 = vmax.f32 %v585_v24, 0.0 }
 0x167   : > { %v586_v25 = vpop.f32.mrf.mxu1 }
 0x168   : > { %v587_v26 = vadd.f32 %v1017_v16, %v586_v25 }
 0x16a   : > { %v622_v28 = vmax.f32 %v587_v26, 0.0 }
 0x16b   : > { %v614_v33 = vpop.f32.mrf.mxu3 }
 0x16c   : > { %v636_v29 = vpack.c.bf16 %v622_v28, %v621_v27  ;;  %v615_v38 = vadd.f32 %v1017_v16, %v614_v33 }
 0x16e   : > { %929 = vmatmul.msk.bf16.gmra.mxu2 %vm663_vm1, %v636_v29  ;;  %v633_v41 = vmax.f32 %v615_v38, 0.0 }
 0x16f   : > { %v589_v30 = vpop.f32.mrf.mxu1 }
 0x170   : > { %v590_v31 = vadd.f32 %v1017_v16, %v589_v30 }
 0x172   : > { %v623_v35 = vmax.f32 %v590_v31, 0.0 }
 0x173   : > { %v616_v40 = vpop.f32.mrf.mxu3 }
 0x174   : > { %v617_v42 = vadd.f32 %v1017_v16, %v616_v40 }
 0x176   : > { %v634_v43 = vmax.f32 %v617_v42, 0.0 }
 0x177   : > { %v591_v32 = vpop.f32.mrf.mxu1 }
 0x178   : > { %v592_v34 = vadd.f32 %v1017_v16, %v591_v32  ;;  %v642_v44 = vpack.c.bf16 %v634_v43, %v633_v41 }
 0x17a   : > { %v624_v36 = vmax.f32 %v592_v34, 0.0  ;;  %935 = vmatmul.msk.bf16.vlgmr.msra.gmra.mxu3 %vm663_vm1, %v642_v44 }
 0x17c   : > { %v637_v37 = vpack.c.bf16 %v624_v36, %v623_v35 }
 0x17e   : > { %930 = vmatmul.msk.bf16.gmra.mxu2 %vm663_vm1, %v637_v37 }
 0x17f   : > { %v594_v39 = vpop.f32.mrf.mxu1 }
 0x180   : > { %v595_v45 = vadd.f32 %v1017_v16, %v594_v39 }
 0x182   : > { %v625_v48 = vmax.f32 %v595_v45, 0.0 }
 0x187   : > { %v596_v46 = vpop.f32.mrf.mxu1 }
 0x188   : > { %v597_v47 = vadd.f32 %v1017_v16, %v596_v46 }
 0x18a   : > { %v626_v49 = vmax.f32 %v597_v47, 0.0 }
 0x18c   : > { %v638_v50 = vpack.c.bf16 %v626_v49, %v625_v48 }
 0x18e   : > { %931 = vmatmul.msk.bf16.gmra.mxu2 %vm663_vm1, %v638_v50 }
 0x18f   : > { %v599_v51 = vpop.f32.mrf.mxu1 }
 0x190   : > { %v600_v52 = vadd.f32 %v1017_v16, %v599_v51 }
 0x192   : > { %v627_v55 = vmax.f32 %v600_v52, 0.0 }
 0x197   : > { %v601_v53 = vpop.f32.mrf.mxu1 }
 0x198   : > { %v602_v54 = vadd.f32 %v1017_v16, %v601_v53 }
 0x19a   : > { %v628_v56 = vmax.f32 %v602_v54, 0.0 }
 0x19c   : > { %v639_v57 = vpack.c.bf16 %v628_v56, %v627_v55 }
 0x19e   : > { %932 = vmatmul.msk.bf16.gmra.mxu2 %vm663_vm1, %v639_v57 }
 0x19f   : > { %v604_v58 = vpop.f32.mrf.mxu1 }
 0x1a0   : > { %v605_v59 = vadd.f32 %v1017_v16, %v604_v58 }
 0x1a2   : > { %v629_v62 = vmax.f32 %v605_v59, 0.0 }
 0x1a7   : > { %v606_v60 = vpop.f32.mrf.mxu1 }
 0x1a8   : > { %v607_v61 = vadd.f32 %v1017_v16, %v606_v60 }
 0x1aa   : > { %v630_v63 = vmax.f32 %v607_v61, 0.0 }
 0x1ac   : > { %v640_v0 = vpack.c.bf16 %v630_v63, %v629_v62 }
 0x1ae   : > { %933 = vmatmul.msk.bf16.gmra.mxu2 %vm663_vm1, %v640_v0 }
 0x1af   : > { %v609_v1 = vpop.f32.mrf.mxu1 }
 0x1b0   : > { %v610_v2 = vadd.f32 %v1017_v16, %v609_v1 }
 0x1b2   : > { %v631_v5 = vmax.f32 %v610_v2, 0.0 }
 0x1b7   : > { %v611_v3 = vpop.f32.mrf.mxu1 }
 0x1b8   : > { %v612_v4 = vadd.f32 %v1017_v16, %v611_v3 }
 0x1ba   : > { %v632_v6 = vmax.f32 %v612_v4, 0.0 }
 0x1bc   : > { %v641_v7 = vpack.c.bf16 %v632_v6, %v631_v5 }
 0x1be   : > { %934 = vmatmul.msk.bf16.gmra.mxu2 %vm663_vm1, %v641_v7 }
 0x1e1   : > { %v697_v9 = vpop.f32.mrf.mxu2 }
 0x1e2   : > { %v698_v10 = vadd.f32 %v1018_v8, %v697_v9 }
 0x1e4   : > { %738 = vst.msk [vmem:[%s1282_s22] sm:$0xff] %vm737_vm2, %v698_v10 }
 0x1e9   : > { %v699_v11 = vpop.f32.mrf.mxu2 }
 0x1ea   : > { %v700_v12 = vadd.f32 %v1018_v8, %v699_v11 }
 0x1ec   : > { %739 = vst.msk [vmem:[%s1282_s22 + $0x8] sm:$0xff] %vm737_vm2, %v700_v12 }
 0x1f1   : > { %v702_v13 = vpop.f32.mrf.mxu2 }
 0x1f2   : > { %v703_v14 = vadd.f32 %v1018_v8, %v702_v13 }
 0x1f4   : > { %740 = vst.msk [vmem:[%s1282_s22 + $0x10] sm:$0xff] %vm737_vm2, %v703_v14 }
 0x1f9   : > { %v704_v15 = vpop.f32.mrf.mxu2 }
 0x1fa   : > { %v705_v16 = vadd.f32 %v1018_v8, %v704_v15 }
 0x1fc   : > { %741 = vst.msk [vmem:[%s1282_s22 + $0x18] sm:$0xff] %vm737_vm2, %v705_v16 }
 0x1fd   : > { %v732_v20 = vpop.f32.mrf.mxu3 }
 0x1fe   : > { %v733_v22 = vadd.f32 %v1018_v8, %v732_v20 }
 0x200   : > { %752 = vst.msk [vmem:[%s1282_s22 + $0x70] sm:$0xff] %vm737_vm2, %v733_v22 }
 0x201   : > { %v707_v17 = vpop.f32.mrf.mxu2 }
 0x202   : > { %v708_v18 = vadd.f32 %v1018_v8, %v707_v17 }
 0x204   : > { %742 = vst.msk [vmem:[%s1282_s22 + $0x20] sm:$0xff] %vm737_vm2, %v708_v18 }
 0x205   : > { %v734_v24 = vpop.f32.mrf.mxu3 }
 0x206   : > { %v735_v26 = vadd.f32 %v1018_v8, %v734_v24 }
 0x208   : > { %753 = vst.msk [vmem:[%s1282_s22 + $0x78] sm:$0xff] %vm737_vm2, %v735_v26 }
 0x209   : > { %v709_v19 = vpop.f32.mrf.mxu2 }
 0x20a   : > { %v710_v21 = vadd.f32 %v1018_v8, %v709_v19 }
 0x20c   : > { %743 = vst.msk [vmem:[%s1282_s22 + $0x28] sm:$0xff] %vm737_vm2, %v710_v21 }
 0x211   : > { %v712_v23 = vpop.f32.mrf.mxu2 }
 0x212   : > { %v713_v25 = vadd.f32 %v1018_v8, %v712_v23 }
 0x214   : > { %744 = vst.msk [vmem:[%s1282_s22 + $0x30] sm:$0xff] %vm737_vm2, %v713_v25 }
 0x219   : > { %v714_v27 = vpop.f32.mrf.mxu2 }
 0x21a   : > { %v715_v28 = vadd.f32 %v1018_v8, %v714_v27 }
 0x21c   : > { %745 = vst.msk [vmem:[%s1282_s22 + $0x38] sm:$0xff] %vm737_vm2, %v715_v28 }
 0x221   : > { %v717_v29 = vpop.f32.mrf.mxu2 }
 0x222   : > { %v718_v30 = vadd.f32 %v1018_v8, %v717_v29 }
 0x224   : > { %746 = vst.msk [vmem:[%s1282_s22 + $0x40] sm:$0xff] %vm737_vm2, %v718_v30 }
 0x229   : > { %v719_v31 = vpop.f32.mrf.mxu2 }
 0x22a   : > { %v720_v32 = vadd.f32 %v1018_v8, %v719_v31 }
 0x22c   : > { %747 = vst.msk [vmem:[%s1282_s22 + $0x48] sm:$0xff] %vm737_vm2, %v720_v32 }
 0x231   : > { %v722_v33 = vpop.f32.mrf.mxu2 }
 0x232   : > { %v723_v34 = vadd.f32 %v1018_v8, %v722_v33 }
 0x234   : > { %748 = vst.msk [vmem:[%s1282_s22 + $0x50] sm:$0xff] %vm737_vm2, %v723_v34 }
 0x239   : > { %v724_v35 = vpop.f32.mrf.mxu2 }
 0x23a   : > { %v725_v36 = vadd.f32 %v1018_v8, %v724_v35 }
 0x23c   : > { %749 = vst.msk [vmem:[%s1282_s22 + $0x58] sm:$0xff] %vm737_vm2, %v725_v36 }
 0x241   : > { %v727_v37 = vpop.f32.mrf.mxu2 }
 0x242   : > { %v728_v38 = vadd.f32 %v1018_v8, %v727_v37 }
 0x244   : > { %750 = vst.msk [vmem:[%s1282_s22 + $0x60] sm:$0xff] %vm737_vm2, %v728_v38 }
 0x249   : > { %v729_v39 = vpop.f32.mrf.mxu2 }
 0x24a   : > { %v730_v40 = vadd.f32 %v1018_v8, %v729_v39 }
 0x24c   : > { %751 = vst.msk [vmem:[%s1282_s22 + $0x68] sm:$0xff] %vm737_vm2, %v730_v40 }
 0x24d PF: > { %p17_p7 = scmp.ge.s32.totalorder %s1147_s29, 4   ;;  %s1340_s24 = smov %s1075_s25 }
 0x24e   : > { %s1341_s25 = smov %s1079_s26  ;;  %s1342_s26 = smov %s1157_s9 }
 0x24f   : > { %s1343_s27 = smov %s1147_s29  ;;  %19 = sbr.rel (!%p17_p7) target bundleno = 3 (0x3), region = 88 }
 0x254   :  { %776 = vsyncpa [#allocation3], 1 }
 0x255   :  { %778 = vsyncpa [#allocation3 + $0x1], 1 }

</bundles_post_ra>
